<compile_context>
chip_gen: v7x
topology: tpu7x:2x2x1
jax: 0.10.0
libtpu: 0.0.40
codegen_flags: <defaults>
</compile_context>

<pallas_src>
import functools

import jax
import jax.numpy as jnp
from jax import lax
from jax.experimental import pallas as pl
from jax.experimental.pallas import tpu as pltpu


def _ceil_to(x, m):
    return ((x + m - 1) // m) * m


def _loss_epilogue(logits, tgt_ref, loss_ref, row_start, *, num_classes, valid_rows):
    """Cross-entropy epilogue on a complete (tm, C_pad) f32 logits tile.

    Writes the row-masked, row-summed loss partial of this batch tile as a
    lane-dense (8, 128) block. `row_start` must be computed at kernel top level
    (never call pl.program_id inside a pl.when body).
    """
    tm_, c_pad = logits.shape
    cls_ids = lax.broadcasted_iota(jnp.int32, (tm_, c_pad), 1)
    # mask padded class lanes before max/exp
    masked = jnp.where(cls_ids < num_classes, logits, jnp.float32(-1e30))
    m = jnp.max(masked, axis=-1, keepdims=True)
    lse = jnp.log(jnp.sum(jnp.exp(masked - m), axis=-1, keepdims=True)) + m
    # no explicit onehot: select the target logit directly (targets < num_classes,
    # so masked == logits at the selected position)
    tgt_logit = jnp.sum(
        jnp.where(cls_ids == tgt_ref[...], masked, jnp.float32(0.0)),
        axis=-1, keepdims=True)
    per_example = lse - tgt_logit                              # (tm, 1)
    # mask padded batch rows (ragged last tile)
    row_ids = row_start + lax.broadcasted_iota(jnp.int32, (tm_, 1), 0)
    per_example = jnp.where(row_ids < valid_rows, per_example, jnp.float32(0.0))
    partial = jnp.sum(per_example, axis=0, keepdims=True)      # (1, 1)
    loss_ref[...] = jnp.broadcast_to(partial, loss_ref.shape).astype(loss_ref.dtype)


def _web_single_pass_kernel(x_ref, w_ref, b_ref, *rest,
                            num_classes, valid_rows, tm, with_loss):
    """Path A: whole weight resident in VMEM, one pass per batch tile, no pl.when."""
    if with_loss:
        tgt_ref, y_ref, loss_ref = rest
    else:
        (y_ref,) = rest
        tgt_ref = loss_ref = None

    row_start = pl.program_id(0) * tm                          # top level only

    # inner model forward: bf16 operands on the MXU, f32 accumulation
    logits = jnp.dot(x_ref[...], w_ref[...],
                     preferred_element_type=jnp.float32) + b_ref[...]
    y_ref[...] = logits.astype(y_ref.dtype)                    # lane-dense store

    if with_loss:
        _loss_epilogue(logits, tgt_ref, loss_ref, row_start,
                       num_classes=num_classes, valid_rows=valid_rows)


def _web_ktile_kernel(x_ref, w_ref, b_ref, *rest,
                      num_classes, valid_rows, tm, with_loss):
    """Path B: K-tiled matmul with a resident f32 VMEM accumulator."""
    if with_loss:
        tgt_ref, y_ref, loss_ref, acc_ref = rest
    else:
        y_ref, acc_ref = rest
        tgt_ref = loss_ref = None

    # Read all grid ids at top level; only captured *values* are used inside
    # the pl.when bodies (interpret-mode safe, and cheaper).
    k = pl.program_id(1)
    num_k = pl.num_programs(1)
    row_start = pl.program_id(0) * tm

    @pl.when(k == 0)
    def _():
        acc_ref[...] = jnp.zeros_like(acc_ref)

    acc_ref[...] += jnp.dot(x_ref[...], w_ref[...],
                            preferred_element_type=jnp.float32)

    @pl.when(k == num_k - 1)
    def _():
        logits = acc_ref[...] + b_ref[...]                     # (tm, C_pad) f32
        y_ref[...] = logits.astype(y_ref.dtype)
        if with_loss:
            _loss_epilogue(logits, tgt_ref, loss_ref, row_start,
                           num_classes=num_classes, valid_rows=valid_rows)


def web_forward(x, w, b, targets=None, *,
                max_resident_w_bytes=8 * 1024 * 1024, max_tk=1024):
    """Pallas implementation of Web.forward -> (y, loss)."""
    B, D = x.shape
    Dw, C = w.shape
    assert Dw == D

    # ---- padded logical shapes ------------------------------------------------
    D_pad = _ceil_to(D, 128)
    # 256-aligned classes fill the 2x256x256 MXU on v6e/v7x; 128 is enough for tiny C.
    C_pad = 128 if C <= 128 else _ceil_to(C, 256)
    # TODO(synk): very large num_classes (e.g. LLM vocabularies) would need an N
    # (class) grid axis with an online-softmax epilogue; untiled C is assumed to fit.

    w_bytes = D_pad * C_pad * 2                                # resident bf16 weight

    def est_bytes(tm_, tk_, resident):
        x_b = 2 * tm_ * tk_ * 2                                # double-buffered bf16 x
        w_b = 2 * w_bytes if resident else 2 * tk_ * C_pad * 2
        y_b = 2 * tm_ * C_pad * 4                              # double-buffered f32 out
        acc_b = 0 if resident else tm_ * C_pad * 4             # f32 accumulator scratch
        epi_b = 4 * tm_ * C_pad * 4                            # epilogue temporaries
        misc = 2 * C_pad * 4 + 4 * tm_ * 4 + 2 * 8 * 128 * 4
        return x_b + w_b + y_b + acc_b + epi_b + misc

    VMEM_BUDGET = 32 * 1024 * 1024                             # safe on v5e/v6e/v7x

    # ---- Path A: hold the whole weight resident, drop the K axis ---------------
    single_pass = (w_bytes <= max_resident_w_bytes
                   and est_bytes(16, D_pad, True) <= VMEM_BUDGET)

    if single_pass:
        tk = D_pad
        grid_k = 1
    else:
        tk = 128
        for cand in (1024, 512, 256, 128):
            if cand <= max_tk and est_bytes(16, cand, False) <= VMEM_BUDGET:
                tk = cand
                break
        tk = min(tk, _ceil_to(D, 128))
        D_pad = _ceil_to(D, tk)
        grid_k = D_pad // tk

    # ---- batch tiling -----------------------------------------------------------
    B_pad = _ceil_to(B, 16)
    tm = 16
    for cand in (512, 256, 128, 64, 32, 16):
        if cand <= max(B_pad, 16) and est_bytes(cand, tk, single_pass) <= VMEM_BUDGET:
            tm = cand
            break
    B_pad = _ceil_to(B, tm)
    grid_m = B_pad // tm
    # v7x has 2 TensorCores: make sure the "parallel" batch axis has >= 2 steps
    # whenever the batch can be split (no downside on single-TC v5e/v6e).
    if grid_m == 1 and tm >= 32:
        tm //= 2
        B_pad = _ceil_to(B, tm)
        grid_m = B_pad // tm

    # ---- operand prep: skip the extra HBM pad/cast pass when already aligned ----
    # TODO(synk): in a training loop, pad/cast W and b once outside the per-step call.
    x_bf = x.astype(jnp.bfloat16)
    x_p = x_bf if (B, D) == (B_pad, D_pad) else (
        jnp.zeros((B_pad, D_pad), jnp.bfloat16).at[:B, :D].set(x_bf))
    w_bf = w.astype(jnp.bfloat16)
    w_p = w_bf if (D, C) == (D_pad, C_pad) else (
        jnp.zeros((D_pad, C_pad), jnp.bfloat16).at[:D, :C].set(w_bf))
    b_f = b.reshape(1, -1).astype(jnp.float32)
    b_p = b_f if C == C_pad else (
        jnp.zeros((1, C_pad), jnp.float32).at[:, :C].set(b_f))

    # ---- specs -------------------------------------------------------------------
    if single_pass:
        grid = (grid_m,)
        x_spec = pl.BlockSpec((tm, tk), lambda i: (i, 0))
        w_spec = pl.BlockSpec((tk, C_pad), lambda i: (0, 0))       # fetched once, stays resident
        b_spec = pl.BlockSpec((1, C_pad), lambda i: (0, 0))
        tgt_spec = pl.BlockSpec((tm, 1), lambda i: (i, 0))
        y_spec = pl.BlockSpec((tm, C_pad), lambda i: (i, 0))
        loss_spec = pl.BlockSpec((8, 128), lambda i: (i, 0))
        scratch = []
        kernel_fn = _web_single_pass_kernel
        dims = ("parallel",)
    else:
        grid = (grid_m, grid_k)
        x_spec = pl.BlockSpec((tm, tk), lambda i, k: (i, k))
        w_spec = pl.BlockSpec((tk, C_pad), lambda i, k: (k, 0))
        b_spec = pl.BlockSpec((1, C_pad), lambda i, k: (0, 0))
        tgt_spec = pl.BlockSpec((tm, 1), lambda i, k: (i, 0))
        y_spec = pl.BlockSpec((tm, C_pad), lambda i, k: (i, 0))
        loss_spec = pl.BlockSpec((8, 128), lambda i, k: (i, 0))
        scratch = [pltpu.VMEM((tm, C_pad), jnp.float32)]
        kernel_fn = _web_ktile_kernel
        dims = ("parallel", "arbitrary")

    compiler_params = pltpu.CompilerParams(
        dimension_semantics=dims,
        vmem_limit_bytes=48 * 1024 * 1024,
    )

    w_passes = 1 if single_pass else grid_m                    # W is re-fetched per batch tile
    flops = 2 * B_pad * D_pad * C_pad
    base_bytes = (B_pad * D_pad * 2 + w_passes * D_pad * C_pad * 2
                  + C_pad * 4 + B_pad * C_pad * 4)

    if targets is None:
        # TODO(synk): CatLoss behavior without targets assumed to return None.
        kernel = functools.partial(kernel_fn, num_classes=C, valid_rows=B,
                                   tm=tm, with_loss=False)
        y_pad = pl.pallas_call(
            kernel,
            out_shape=jax.ShapeDtypeStruct((B_pad, C_pad), jnp.float32),
            grid_spec=pltpu.PrefetchScalarGridSpec(
                num_scalar_prefetch=0,
                grid=grid,
                in_specs=[x_spec, w_spec, b_spec],
                out_specs=y_spec,
                scratch_shapes=scratch,
            ),
            compiler_params=compiler_params,
            cost_estimate=pl.CostEstimate(
                flops=flops, transcendentals=0, bytes_accessed=base_bytes),
        )(x_p, w_p, b_p)
        return y_pad[:B, :C], None

    tgt_i = targets.astype(jnp.int32).reshape(B, 1)
    tgt_p = tgt_i if B == B_pad else (
        jnp.zeros((B_pad, 1), jnp.int32).at[:B].set(tgt_i))

    kernel = functools.partial(kernel_fn, num_classes=C, valid_rows=B,
                               tm=tm, with_loss=True)
    y_pad, loss_part = pl.pallas_call(
        kernel,
        out_shape=(
            jax.ShapeDtypeStruct((B_pad, C_pad), jnp.float32),
            jax.ShapeDtypeStruct((grid_m * 8, 128), jnp.float32),  # per-tile partials
        ),
        grid_spec=pltpu.PrefetchScalarGridSpec(
            num_scalar_prefetch=0,
            grid=grid,
            in_specs=[x_spec, w_spec, b_spec, tgt_spec],
            out_specs=(y_spec, loss_spec),
            scratch_shapes=scratch,
        ),
        compiler_params=compiler_params,
        cost_estimate=pl.CostEstimate(
            flops=flops,
            transcendentals=B_pad * C_pad,
            bytes_accessed=base_bytes + B_pad * 4 + grid_m * 8 * 128 * 4),
    )(x_p, w_p, b_p, tgt_p)

    # one partial per batch tile (replicated over an (8,128) lane-dense block)
    loss = jnp.sum(loss_part[::8, 0]) / B                      # mean over the real batch
    return y_pad[:B, :C], loss


def _reference(x, w, b, targets):
    # Same numerics as the kernel: bf16 operands, f32 accumulation, f32 loss.
    logits = jnp.dot(x.astype(jnp.bfloat16), w.astype(jnp.bfloat16),
                     preferred_element_type=jnp.float32) + b.astype(jnp.float32)
    lse = jax.nn.logsumexp(logits, axis=-1)
    tgt_logit = jnp.take_along_axis(logits, targets[:, None], axis=-1)[:, 0]
    return logits, jnp.mean(lse - tgt_logit)


if __name__ == "__main__":
    key = jax.random.PRNGKey(0)
    kx, kw, kb, kt = jax.random.split(key, 4)

    # --- small classifier shapes (Path A: weight resident, single pass) ---
    B, D, C = 8, 32, 16  # batch, in_features, num_classes
    x = jax.random.normal(kx, (B, D), jnp.float32)
    w = jax.random.normal(kw, (D, C), jnp.float32) * 0.1   # synthetic weights
    b = jax.random.normal(kb, (1, C), jnp.float32) * 0.01
    targets = jax.random.randint(kt, (B,), 0, C, dtype=jnp.int32)

    y, loss = web_forward(x, w, b, targets)
    jax.block_until_ready((y, loss))
    y_ref, loss_ref = _reference(x, w, b, targets)
    assert jnp.allclose(y, y_ref, atol=2e-3, rtol=2e-3), "logits mismatch (path A)"
    assert jnp.allclose(loss, loss_ref, atol=2e-3, rtol=2e-3), "loss mismatch (path A)"

    # targets=None path (loss is None, mirrors frozen inference use)
    y2, loss2 = web_forward(x, w, b, None)
    jax.block_until_ready(y2)
    assert loss2 is None
    assert jnp.allclose(y2, y_ref, atol=2e-3, rtol=2e-3)

    # --- forced K-tiled path (Path B) with ragged batch / padded classes ---
    k2 = jax.random.PRNGKey(1)
    kx2, kw2, kb2, kt2 = jax.random.split(k2, 4)
    B2, D2, C2 = 24, 384, 200
    x2 = jax.random.normal(kx2, (B2, D2), jnp.float32)
    w2 = jax.random.normal(kw2, (D2, C2), jnp.float32) * 0.05
    b2 = jax.random.normal(kb2, (1, C2), jnp.float32) * 0.01
    t2 = jax.random.randint(kt2, (B2,), 0, C2, dtype=jnp.int32)

    y3, loss3 = web_forward(x2, w2, b2, t2, max_resident_w_bytes=0, max_tk=128)
    jax.block_until_ready((y3, loss3))
    y3_ref, loss3_ref = _reference(x2, w2, b2, t2)
    assert jnp.allclose(y3, y3_ref, atol=5e-3, rtol=5e-3), "logits mismatch (path B)"
    assert jnp.allclose(loss3, loss3_ref, atol=5e-3, rtol=5e-3), "loss mismatch (path B)"

    print("KERNEL_OK")
</pallas_src>

<mosaic_0001>
module attributes {stable_mosaic.version = 11 : i64} {
  func.func @_web_single_pass_kernel(%arg0: i32, %arg1: memref<16x128xbf16, #tpu.memory_space<vmem>>, %arg2: memref<128x128xbf16, #tpu.memory_space<vmem>>, %arg3: memref<1x128xf32, #tpu.memory_space<vmem>>, %arg4: memref<16x1xi32, #tpu.memory_space<vmem>>, %arg5: memref<16x128xf32, #tpu.memory_space<vmem>>, %arg6: memref<8x128xf32, #tpu.memory_space<vmem>>) attributes {dimension_semantics = [#tpu.dimension_semantics<parallel>], iteration_bounds = array<i64: 1>, scalar_prefetch = 0 : i64, scratch_operands = 0 : i64, tpu.core_type = #tpu.core_type<tc>, window_params = [{transform_indices = @transform_0, window_bounds = array<i64: 16, 128>}, {pipeline_mode = #tpu.pipeline_mode<synchronous>, transform_indices = @transform_1, window_bounds = array<i64: 128, 128>}, {pipeline_mode = #tpu.pipeline_mode<synchronous>, transform_indices = @transform_2, window_bounds = array<i64: 1, 128>}, {transform_indices = @transform_3, window_bounds = array<i64: 16, 1>}, {transform_indices = @transform_4, window_bounds = array<i64: 16, 128>}, {transform_indices = @transform_5, window_bounds = array<i64: 8, 128>}]} {
    %c16_i32 = arith.constant 16 : i32
    %0 = arith.muli %arg0, %c16_i32 : i32
    %c0 = arith.constant 0 : index
    %c0_0 = arith.constant 0 : index
    %1 = vector.load %arg1[%c0, %c0_0] : memref<16x128xbf16, #tpu.memory_space<vmem>>, vector<16x128xbf16>
    %c0_1 = arith.constant 0 : index
    %c0_2 = arith.constant 0 : index
    %2 = vector.load %arg2[%c0_1, %c0_2] : memref<128x128xbf16, #tpu.memory_space<vmem>>, vector<128x128xbf16>
    %cst = arith.constant dense<0.000000e+00> : vector<16x128xf32>
    %3 = tpu.matmul %1, %2, %cst {dimension_numbers = #tpu.dot_dimension_numbers<[1], [0], [0], [1], [0, 0, 1, 1], [], []>} : vector<16x128xbf16>, vector<128x128xbf16>, vector<16x128xf32> -> vector<16x128xf32>
    %c0_3 = arith.constant 0 : index
    %c0_4 = arith.constant 0 : index
    %4 = vector.load %arg3[%c0_3, %c0_4] : memref<1x128xf32, #tpu.memory_space<vmem>>, vector<1x128xf32>
    %5 = vector.broadcast %4 : vector<1x128xf32> to vector<16x128xf32>
    %6 = arith.addf %3, %5 : vector<16x128xf32>
    %c0_5 = arith.constant 0 : index
    %c0_6 = arith.constant 0 : index
    %7 = vector.load %arg5[%c0_5, %c0_6] : memref<16x128xf32, #tpu.memory_space<vmem>>, vector<16x128xf32>
    tpu.vector_store %arg5[%c0_5, %c0_6], %6 {strides = array<i32>} : memref<16x128xf32, #tpu.memory_space<vmem>>, vector<16x128xf32>,
    %8 = tpu.iota {dimensions = array<i32: 1>} : vector<16x128xi32>
    %c16_i32_7 = arith.constant 16 : i32
    %9 = vector.broadcast %c16_i32_7 : i32 to vector<16x128xi32>
    %10 = arith.cmpi slt, %8, %9 : vector<16x128xi32>
    %cst_8 = arith.constant -1.000000e+30 : f32
    %11 = vector.broadcast %cst_8 : f32 to vector<16x128xf32>
    %12 = arith.select %10, %6, %11 : vector<16x128xi1>, vector<16x128xf32>
    %cst_9 = arith.constant dense<0xFF800000> : vector<16xf32>
    %13 = vector.multi_reduction <maximumf>, %12, %cst_9 [1] : vector<16x128xf32> to vector<16xf32>
    %14 = vector.shape_cast %13 : vector<16xf32> to vector<16x1xf32>
    %15 = vector.broadcast %14 : vector<16x1xf32> to vector<16x128xf32>
    %16 = arith.subf %12, %15 : vector<16x128xf32>
    %17 = math.exp %16 : vector<16x128xf32>
    %cst_10 = arith.constant dense<0.000000e+00> : vector<16xf32>
    %18 = vector.multi_reduction <add>, %17, %cst_10 [1] : vector<16x128xf32> to vector<16xf32>
    %19 = vector.shape_cast %18 : vector<16xf32> to vector<16x1xf32>
    %20 = math.log %19 : vector<16x1xf32>
    %21 = arith.addf %20, %14 : vector<16x1xf32>
    %c0_11 = arith.constant 0 : index
    %c0_12 = arith.constant 0 : index
    %22 = vector.load %arg4[%c0_11, %c0_12] : memref<16x1xi32, #tpu.memory_space<vmem>>, vector<16x1xi32>
    %23 = vector.broadcast %22 : vector<16x1xi32> to vector<16x128xi32>
    %24 = arith.cmpi eq, %8, %23 : vector<16x128xi32>
    %cst_13 = arith.constant 0.000000e+00 : f32
    %25 = vector.broadcast %cst_13 : f32 to vector<16x128xf32>
    %26 = arith.select %24, %12, %25 : vector<16x128xi1>, vector<16x128xf32>
    %cst_14 = arith.constant dense<0.000000e+00> : vector<16xf32>
    %27 = vector.multi_reduction <add>, %26, %cst_14 [1] : vector<16x128xf32> to vector<16xf32>
    %28 = vector.shape_cast %27 : vector<16xf32> to vector<16x1xf32>
    %29 = arith.subf %21, %28 : vector<16x1xf32>
    %30 = tpu.iota {dimensions = array<i32: 0>} : vector<16x1xi32>
    %31 = vector.broadcast %0 : i32 to vector<16x1xi32>
    %32 = arith.addi %31, %30 : vector<16x1xi32>
    %c8_i32 = arith.constant 8 : i32
    %33 = vector.broadcast %c8_i32 : i32 to vector<16x1xi32>
    %34 = arith.cmpi slt, %32, %33 : vector<16x1xi32>
    %cst_15 = arith.constant 0.000000e+00 : f32
    %35 = vector.broadcast %cst_15 : f32 to vector<16x1xf32>
    %36 = arith.select %34, %29, %35 : vector<16x1xi1>, vector<16x1xf32>
    %cst_16 = arith.constant dense<0.000000e+00> : vector<1xf32>
    %37 = vector.multi_reduction <add>, %36, %cst_16 [0] : vector<16x1xf32> to vector<1xf32>
    %38 = vector.shape_cast %37 : vector<1xf32> to vector<1x1xf32>
    %39 = vector.shape_cast %38 : vector<1x1xf32> to vector<1x1xf32>
    %40 = vector.broadcast %39 : vector<1x1xf32> to vector<8x128xf32>
    %c0_17 = arith.constant 0 : index
    %c0_18 = arith.constant 0 : index
    %41 = vector.load %arg6[%c0_17, %c0_18] : memref<8x128xf32, #tpu.memory_space<vmem>>, vector<8x128xf32>
    tpu.vector_store %arg6[%c0_17, %c0_18], %40 {strides = array<i32>} : memref<8x128xf32, #tpu.memory_space<vmem>>, vector<8x128xf32>,
    return
  }
  func.func @transform_0(%arg0: i32) -> (i32, i32) {
    %c0_i32 = arith.constant 0 : i32
    %c0_i32_0 = arith.constant 0 : i32
    return %arg0, %c0_i32 : i32, i32
  }
  func.func @transform_1(%arg0: i32) -> (i32, i32) {
    %c0_i32 = arith.constant 0 : i32
    %c0_i32_0 = arith.constant 0 : i32
    %c0_i32_1 = arith.constant 0 : i32
    return %c0_i32, %c0_i32_0 : i32, i32
  }
  func.func @transform_2(%arg0: i32) -> (i32, i32) {
    %c0_i32 = arith.constant 0 : i32
    %c0_i32_0 = arith.constant 0 : i32
    %c0_i32_1 = arith.constant 0 : i32
    return %c0_i32, %c0_i32_0 : i32, i32
  }
  func.func @transform_3(%arg0: i32) -> (i32, i32) {
    %c0_i32 = arith.constant 0 : i32
    %c0_i32_0 = arith.constant 0 : i32
    return %arg0, %c0_i32 : i32, i32
  }
  func.func @transform_4(%arg0: i32) -> (i32, i32) {
    %c0_i32 = arith.constant 0 : i32
    %c0_i32_0 = arith.constant 0 : i32
    return %arg0, %c0_i32 : i32, i32
  }
  func.func @transform_5(%arg0: i32) -> (i32, i32) {
    %c0_i32 = arith.constant 0 : i32
    %c0_i32_0 = arith.constant 0 : i32
    return %arg0, %c0_i32 : i32, i32
  }
}

</mosaic_0001>

<bundles_post_ra>
// kernel: tpu_custom_call.1
= control target key start
LH: loop header
LB: loop body
LE: loop exit
PB: predicated region body
PF: predicated region fallthrough
CT: control target
= control target key end

     0   :  { %11 = vsyncpa [#allocation3], 0  ;;  %s471_s0 = inlined_call_operand.vmem [shape: bf16[16,128], index: 0, kind: input, shape index: {}]   ;;  %s472_s1 = inlined_call_operand.hbm [shape: bf16[128,128], index: 1, kind: input, shape index: {}]   ;;  %s473_s2 = inlined_call_operand.vmem [shape: f32[1,128], index: 2, kind: input, shape index: {}]   ;;  %s474_s3 = inlined_call_operand.vmem [shape: s32[16,1], index: 3, kind: input, shape index: {}]   ;;  %s475_s4 = inlined_call_operand.hbm [shape: f32[16,128], index: 4, kind: output, shape index: {0}]   ;;  %s476_s5 = inlined_call_operand.hbm [shape: f32[8,128], index: 5, kind: output, shape index: {1}]  }
   0x1   :  { %12 = vsyncpa [#allocation4], 0 }
   0x2   :  { %13 = vsyncpa [#allocation7], 0  ;;  %s386_s18 = smov [#allocation2]   ;;  %s314_s22 = scalar_lea.hbm %s472_s1, 1024 }
   0x3   :  { %s21_s19 = sshll.u32 %s386_s18, 4  ;;  %p315_p0 = scmp.ne.s32.totalorder %s472_s1, %s314_s22  ;;  %s22_s19 = int_to_ptr.vmem [resolvable:$true] %s21_s19 }
   0x4   :  { %p318_p1 = scmp.lt.u32.totalorder %s314_s22, %s472_s1 }
   0x6   :  { %p320_p2 = pnand %p318_p1, %p315_p0 }
   0x8   :  { %323 = shalt.err (!%p320_p2)
}
   0x9   :  { %s324_s27 = scalar_lea.vmem %s22_s19, 1024  ;;  %p329_p4 = scmp.lt.s32.totalorder %s22_s19, %s22_s19 }
   0xa   :  { %p325_p3 = scmp.ne.s32.totalorder %s22_s19, %s324_s27  ;;  %p330_p5 = scmp.lt.s32.totalorder %s324_s27, %s324_s27 }
   0xc   :  { %p331_p6 = por %p330_p5, %p329_p4 }
   0xe   :  { %p332_p7 = pnand %p331_p6, %p325_p3 }
  0x10   :  { %335 = shalt.err (!%p332_p7)
}
  0x11   :  { %s387_s28 = smov 64   ;;  %s388_s29 = smov 4  }
  0x12   :  { %27 = dma.hbm_to_vmem [thread:$0]  %s472_s1, 1024, %s22_s19, [#allocation3], %s387_s28, %s387_s28, %s388_s29  }
  0x13   :  { %380 = dma.done.wait [#allocation3], 1024  }
  0x14   :  { %381 = vsyncadd [#allocation3], 4294966272  ;;  %v389_v0 = vmov 0.0   ;;  %vm390_vm0 = vmmov 0   ;;  %v301_v1 = vld [vmem:[#allocation2] sm:$0xff]   ;;  %v302_v2 = vld [vmem:[#allocation2 + $0x8] sm:$0xff]   ;;  %v159_v11 = vlaneseq }
  0x15   :  { %270 = vmatprep.subr.bf16.mxu0 %v389_v0  ;;  %286 = vmatprep.mubr.msk.bf16.mxu0 %vm390_vm0, %v389_v0  ;;  %v303_v3 = vld [vmem:[#allocation2 + $0x10] sm:$0xff]   ;;  %v304_v4 = vld [vmem:[#allocation2 + $0x18] sm:$0xff]   ;;  %v305_v5 = vld [vmem:[#allocation2 + $0x20] sm:$0xff]   ;;  %v391_v10 = vmov 0  }
  0x16   :  { %271 = vmatpush3.bf16.msra.mxu0 %v301_v1  ;;  %v306_v6 = vld [vmem:[#allocation2 + $0x28] sm:$0xff]   ;;  %v307_v7 = vld [vmem:[#allocation2 + $0x30] sm:$0xff]   ;;  %v308_v8 = vld [vmem:[#allocation2 + $0x38] sm:$0xff]   ;;  %300 = vset.pattern.permute.xlu0 %v391_v10  ;;  %v160_v12 = vand.u32 127, %v159_v11 }
  0x17   :  { %272 = vmatprep.subr.bf16.mxu0 %v389_v0  ;;  %v309_v9 = vld [vmem:[%s471_s0] sm:$0xff]  }
  0x18   :  { %v251_v13 = vld [vmem:[%s473_s2] ss:$0 sm:$0xff]  ;;  %vm161_vm1 = vcmp.lt.s32.totalorder %v160_v12, 16  ;;  %s392_s2 = smov [#allocation5]  }
  0x19   :  { %v184_v21 = vld [vmem:[%s474_s3] sm:$0xff]  ;;  %s225_s11 = sshll.u32 %s392_s2, 4  ;;  %s226_s11 = int_to_ptr.vmem [resolvable:$true] %s225_s11 }
  0x1a   :  { %273 = vmatpush3.bf16.msra.mxu0 %v302_v2  ;;  %s336_s12 = scalar_lea.vmem %s226_s11, 256  ;;  %p341_p9 = scmp.lt.s32.totalorder %s226_s11, %s226_s11 }
  0x1b   :  { %274 = vmatprep.subr.bf16.mxu0 %v389_v0  ;;  %p337_p8 = scmp.ne.s32.totalorder %s226_s11, %s336_s12  ;;  %p342_p10 = scmp.lt.s32.totalorder %s336_s12, %s336_s12 }
  0x1d   :  { %p343_p11 = por %p342_p10, %p341_p9 }
  0x1e   :  { %275 = vmatpush3.bf16.msra.mxu0 %v303_v3 }
  0x1f   :  { %276 = vmatprep.subr.bf16.mxu0 %v389_v0  ;;  %p344_p12 = pnand %p343_p11, %p337_p8 }
  0x22   :  { %277 = vmatpush3.bf16.msra.mxu0 %v304_v4 }
  0x23   :  { %278 = vmatprep.subr.bf16.mxu0 %v389_v0 }
  0x26   :  { %279 = vmatpush3.bf16.msra.mxu0 %v305_v5 }
  0x27   :  { %280 = vmatprep.subr.bf16.mxu0 %v389_v0 }
  0x2a   :  { %281 = vmatpush3.bf16.msra.mxu0 %v306_v6 }
  0x2b   :  { %282 = vmatprep.subr.bf16.mxu0 %v389_v0 }
  0x2e   :  { %283 = vmatpush3.bf16.msra.mxu0 %v307_v7 }
  0x2f   :  { %284 = vmatprep.subr.bf16.mxu0 %v389_v0 }
  0x32   :  { %285 = vmatpush3.bf16.msra.mxu0 %v308_v8 }
  0x35   :  { %287 = vmatmul.mubr.bf16.vlgmr.msra.gmra.mrb[0].mxu0 %v309_v9 }
 0x108   :  { %v150_v14 = vpop.f32.mrb[0].mxu0 }
 0x109   :  { %v151_v15 = vadd.f32 %v251_v13, %v150_v14  ;;  %v288_v16 = vpop.f32.mrb[1].mxu0 }
 0x10a   :  { %v153_v17 = vpop.f32.mrb[2].mxu0 }
 0x10b   :  { %157 = vst [vmem:[#allocation5] sm:$0xff] %v151_v15  ;;  %v154_v18 = vadd.f32 %v251_v13, %v153_v17  ;;  %v289_v19 = vpop.f32.mrb[3].mxu0  ;;  %v162_v20 = vsel %vm161_vm1, %v151_v15, -1e+30 }
 0x10c   :  { %164 = vmax.xlane.f32.xlu0 %v162_v20 }
 0x10d   :  { %158 = vst [vmem:[#allocation5 + $0x8] sm:$0xff] %v154_v18 }
 0x122   :  { %187 = vperm.xlu0 %300, %v184_v21  }
 0x199   :  { %v165_v22 = vpop.xlane.xlu0 %164 }
 0x19a   :  { %v168_v23 = vsub.f32 %v162_v20, %v165_v22 }
 0x19c   :  { %v170_v24 = vmul.f32 1.442695, %v168_v23 }
 0x19e   :  { %310 = vpow2.f32 %v170_v24 }
 0x1a1   :  { %v188_v25 = vpop.permute.xlu0 %187 }
 0x1a2   :  { %vm192_vm2 = vcmp.eq.s32.totalorder %v160_v12, %v188_v25 }
 0x1a3   :  { %v194_v27 = vsel %vm192_vm2, %v162_v20, 0.0 }
 0x1a8   :  { %v311_v26 = vpop.eup %310 }
 0x1a9   :  { %174 = vadd.xlane.f32.xlu1 %v311_v26 }
 0x1ad   :  { %196 = vadd.xlane.f32.xlu1 %v194_v27 }
 0x1ae   :  { %347 = shalt.err (!%p344_p12)
}
 0x1af   :  { %s348_s14 = scalar_lea.hbm %s475_s4, 256 }
 0x1b0   :  { %p349_p13 = scmp.ne.s32.totalorder %s475_s4, %s348_s14  ;;  %p352_p0 = scmp.lt.u32.totalorder %s348_s14, %s475_s4 }
 0x1b2   :  { %p354_p1 = pnand %p352_p0, %p349_p13 }
 0x1b4   :  { %357 = shalt.err (!%p354_p1)
}
 0x1b5   :  { %s393_s19 = smov 128   ;;  %s394_s20 = smov 8  }
 0x1b6   :  { %231 = dma.vmem_to_hbm [thread:$0]  %s226_s11, 256, %s475_s4, [#allocation4], %s393_s19, %s393_s19, %s394_s20  }
 0x1b7   :  { %s395_s23 = smov [#allocation6]  }
 0x1b8   :  { %s238_s24 = sshll.u32 %s395_s23, 4  ;;  %s239_s24 = int_to_ptr.vmem [resolvable:$true] %s238_s24 }
 0x1b9   :  { %s358_s25 = scalar_lea.vmem %s239_s24, 128  ;;  %p363_p3 = scmp.lt.s32.totalorder %s239_s24, %s239_s24 }
 0x1ba   :  { %p359_p2 = scmp.ne.s32.totalorder %s239_s24, %s358_s25  ;;  %p364_p4 = scmp.lt.s32.totalorder %s358_s25, %s358_s25 }
 0x1bc   :  { %p365_p5 = por %p364_p4, %p363_p3 }
 0x1be   :  { %p366_p6 = pnand %p365_p5, %p359_p2 }
 0x236   :  { %v175_v28 = vpop.xlane.xlu1 %174 }
 0x237   :  { %312 = vlog2.f32 %v175_v28 }
 0x23a   :  { %v197_v32 = vpop.xlane.xlu1 %196 }
 0x241   :  { %v313_v29 = vpop.eup %312 }
 0x242   :  { %v179_v30 = vmul.f32 0.6931472, %v313_v29 }
 0x244   :  { %v182_v31 = vadd.f32 %v179_v30, %v165_v22 }
 0x246   :  { %v200_v33 = vsub.f32 %v182_v31, %v197_v32 }
 0x248   :  { %v213_v34 = vrot.slane %v200_v33, 4 }
 0x24a   :  { %v214_v35 = vadd.f32 %v213_v34, %v200_v33 }
 0x24c   :  { %v215_v36 = vrot.slane %v214_v35, 2 }
 0x24e   :  { %v216_v37 = vadd.f32 %v215_v36, %v214_v35 }
 0x250   :  { %v217_v38 = vrot.slane %v216_v37, 1 }
 0x252   :  { %v218_v39 = vadd.f32 %v217_v38, %v216_v37 }
 0x254   :  { %219 = vst [vmem:[#allocation6] sm:$0xff] %v218_v39 }
 0x255   :  { %369 = shalt.err (!%p366_p6)
}
 0x256   :  { %s370_s27 = scalar_lea.hbm %s476_s5, 128 }
 0x257   :  { %p371_p7 = scmp.ne.s32.totalorder %s476_s5, %s370_s27  ;;  %p374_p8 = scmp.lt.u32.totalorder %s370_s27, %s476_s5 }
 0x259   :  { %p376_p9 = pnand %p374_p8, %p371_p7 }
 0x25b   :  { %379 = shalt.err (!%p376_p9)
}
 0x25c   :  { %241 = dma.vmem_to_hbm [thread:$0]  %s239_s24, 128, %s476_s5, [#allocation7]  }
 0x25d   :  { %382 = dma.done.wait [#allocation4], 256  }
 0x25e   :  { %383 = vsyncadd [#allocation4], 4294967040 }
 0x25f   :  { %384 = dma.done.wait [#allocation7], 128  }
 0x260   :  { %385 = vsyncadd [#allocation7], 4294967168 }
 0x261   :  { %248 = vsyncpa [#allocation3], 1 }
 0x262   :  { %249 = vsyncpa [#allocation4], 1 }
 0x263   :  { %250 = vsyncpa [#allocation7], 1 }

</bundles_post_ra>
